<compile_context>
chip_gen: v7x
topology: tpu7x:2x2x1
jax: 0.10.0
libtpu: 0.0.40
codegen_flags: <defaults>
</compile_context>

<pallas_src>
import jax
import jax.numpy as jnp
import numpy as np
from jax import lax
from jax.experimental import pallas as pl
from jax.experimental.pallas import tpu as pltpu

BN_EPS = 1e-5  # nn.BatchNorm2d default


# --------------------------------------------------------------------------
# Pallas kernel
# --------------------------------------------------------------------------
def _nam_kernel(x_ref, sg_ref, tg_ref, w_ref, b_ref, o_ref):
    x = x_ref[0]                                          # (C, T) f32, lane = spatial
    # NAM channel gate: sigmoid(weight_bn * BN(x)); BN + weight_bn are folded
    # into a single per-channel scale/shift (sg, tg) on the host.
    gate = jax.nn.sigmoid(x * sg_ref[...] + tg_ref[...])
    gated = (gate * x).astype(jnp.bfloat16)               # gate * residual
    # Conv1x1 + folded BN as one channel matmul on the MXU (f32 accumulate).
    y = jnp.dot(w_ref[...], gated,
                preferred_element_type=jnp.float32) + b_ref[...]
    o_ref[0] = (y * jax.nn.sigmoid(y)).astype(o_ref.dtype)  # SiLU


def _pick_hw_tile(hw, max_tile=4096):
    """Largest lane-aligned spatial tile that evenly divides H*W."""
    if hw <= max_tile:
        return hw
    t = max_tile - max_tile % 128
    while t >= 128:
        if hw % t == 0:
            return t
        t -= 128
    return hw


def nam_forward(xs, fused_params):
    """xs: list of (N, c_i, H, W) f32 (concatenated on channels) or a single
    (N, C, H, W) tensor. Returns (N, C2, H, W) f32."""
    sg, tg, w_bf16, b_conv = fused_params
    x = jnp.concatenate(xs, axis=1) if isinstance(xs, (list, tuple)) else xs
    N, C, H, W = x.shape
    C2 = w_bf16.shape[0]
    HW = H * W

    x_flat = x.reshape(N, C, HW)          # free: NCHW is already contiguous
    T = _pick_hw_tile(HW)
    grid = (N, HW // T)

    out_flat = pl.pallas_call(
        _nam_kernel,
        out_shape=jax.ShapeDtypeStruct((N, C2, HW), jnp.float32),
        grid_spec=pltpu.PrefetchScalarGridSpec(
            num_scalar_prefetch=0,
            grid=grid,
            in_specs=[
                pl.BlockSpec((1, C, T), lambda b, j: (b, 0, j)),   # x
                pl.BlockSpec((C, 1), lambda b, j: (0, 0)),         # gate scale
                pl.BlockSpec((C, 1), lambda b, j: (0, 0)),         # gate shift
                pl.BlockSpec((C2, C), lambda b, j: (0, 0)),        # folded conv w (bf16)
                pl.BlockSpec((C2, 1), lambda b, j: (0, 0)),        # folded conv bias
            ],
            out_specs=pl.BlockSpec((1, C2, T), lambda b, j: (b, 0, j)),
        ),
        compiler_params=pltpu.CompilerParams(
            dimension_semantics=("parallel", "parallel")),
    )(x_flat, sg, tg, w_bf16, b_conv)

    return out_flat.reshape(N, C2, H, W)


# --------------------------------------------------------------------------
# Deterministic parameters and host-side folding
# --------------------------------------------------------------------------
def make_raw_params(key, channels, c2):
    ks = iter(jax.random.split(key, 10))

    def bn_params(c):
        return dict(
            gamma=1.0 + 0.1 * jax.random.normal(next(ks), (c,), jnp.float32),
            beta=0.1 * jax.random.normal(next(ks), (c,), jnp.float32),
            mean=0.1 * jax.random.normal(next(ks), (c,), jnp.float32),
            var=1.0 + 0.1 * jax.random.uniform(next(ks), (c,), jnp.float32),
        )

    return dict(
        bn2=bn_params(channels),                                          # NAM gate BN
        conv_w=0.2 * jax.random.normal(next(ks), (c2, channels, 1, 1),
                                       jnp.float32),                      # Conv 1x1 (no bias)
        bn=bn_params(c2),                                                 # Conv's BN
    )


def fuse_for_kernel(raw):
    # NAM gate: weight_bn * BN(x)  ->  x * sg + tg
    bn2 = raw["bn2"]
    s_bn = bn2["gamma"] / jnp.sqrt(bn2["var"] + BN_EPS)
    wbn = jnp.abs(bn2["gamma"]) / jnp.sum(jnp.abs(bn2["gamma"]))
    sg = (wbn * s_bn)[:, None]                                            # (C, 1)
    tg = (wbn * (bn2["beta"] - bn2["mean"] * s_bn))[:, None]              # (C, 1)

    # Conv1x1 + BN folded into one (C2, C) weight + (C2, 1) bias.
    bn = raw["bn"]
    s2 = bn["gamma"] / jnp.sqrt(bn["var"] + BN_EPS)
    w = raw["conv_w"][:, :, 0, 0]                                         # (C2, C)
    wf = (s2[:, None] * w).astype(jnp.bfloat16)
    bf = (bn["beta"] - bn["mean"] * s2)[:, None]                          # (C2, 1) f32
    return sg, tg, wf, bf


# --------------------------------------------------------------------------
# Pure-JAX reference (NCHW, mirrors the PyTorch forward) for validation
# --------------------------------------------------------------------------
def ref_forward(xs, raw):
    x = jnp.concatenate(xs, axis=1) if isinstance(xs, (list, tuple)) else xs
    residual = x

    bn2 = raw["bn2"]
    s = bn2["gamma"] / jnp.sqrt(bn2["var"] + BN_EPS)
    xb = (x - bn2["mean"][None, :, None, None]) * s[None, :, None, None] \
        + bn2["beta"][None, :, None, None]
    wbn = jnp.abs(bn2["gamma"]) / jnp.sum(jnp.abs(bn2["gamma"]))
    xw = xb * wbn[None, :, None, None]
    x = jax.nn.sigmoid(xw) * residual

    y = lax.conv_general_dilated(
        x, raw["conv_w"], (1, 1), ((0, 0), (0, 0)),
        dimension_numbers=("NCHW", "OIHW", "NCHW"))
    bn = raw["bn"]
    s2 = bn["gamma"] / jnp.sqrt(bn["var"] + BN_EPS)
    y = y * s2[None, :, None, None] \
        + (bn["beta"] - bn["mean"] * s2)[None, :, None, None]
    return y * jax.nn.sigmoid(y)                                          # SiLU


# --------------------------------------------------------------------------
if __name__ == "__main__":
    key = jax.random.PRNGKey(0)
    kx1, kx2, kp = jax.random.split(key, 3)

    # NAM(channels=4, c2=8); input is a list of two 2-channel maps (torch.cat).
    N, channels, c2 = 2, 4, 8
    H = W = 16

    xs = [jax.random.normal(kx1, (N, channels // 2, H, W), jnp.float32),
          jax.random.normal(kx2, (N, channels // 2, H, W), jnp.float32)]

    raw = make_raw_params(kp, channels, c2)
    fused = fuse_for_kernel(raw)

    out = jax.block_until_ready(nam_forward(xs, fused))
    assert out.shape == (N, c2, H, W)

    ref = jax.block_until_ready(ref_forward(xs, raw))
    if not np.allclose(np.asarray(out), np.asarray(ref), rtol=5e-2, atol=5e-2):
        max_err = float(jnp.max(jnp.abs(out - ref)))
        raise SystemExit(f"mismatch vs reference, max abs err = {max_err}")

    # TODO(synk): training-mode BatchNorm (batch statistics + running-stat
    # updates) is not modeled; BN is folded in eval mode.
    print("KERNEL_OK")
</pallas_src>

<mosaic_0001>
module attributes {stable_mosaic.version = 11 : i64} {
  func.func @_nam_kernel(%arg0: i32, %arg1: i32, %arg2: memref<1x4x256xf32, #tpu.memory_space<vmem>>, %arg3: memref<4x1xf32, #tpu.memory_space<vmem>>, %arg4: memref<4x1xf32, #tpu.memory_space<vmem>>, %arg5: memref<8x4xbf16, #tpu.memory_space<vmem>>, %arg6: memref<8x1xf32, #tpu.memory_space<vmem>>, %arg7: memref<1x8x256xf32, #tpu.memory_space<vmem>>) attributes {dimension_semantics = [#tpu.dimension_semantics<parallel>, #tpu.dimension_semantics<parallel>], iteration_bounds = array<i64: 2, 1>, scalar_prefetch = 0 : i64, scratch_operands = 0 : i64, tpu.core_type = #tpu.core_type<tc>, window_params = [{transform_indices = @transform_0, window_bounds = array<i64: 1, 4, 256>}, {pipeline_mode = #tpu.pipeline_mode<synchronous>, transform_indices = @transform_1, window_bounds = array<i64: 4, 1>}, {pipeline_mode = #tpu.pipeline_mode<synchronous>, transform_indices = @transform_2, window_bounds = array<i64: 4, 1>}, {pipeline_mode = #tpu.pipeline_mode<synchronous>, transform_indices = @transform_3, window_bounds = array<i64: 8, 4>}, {pipeline_mode = #tpu.pipeline_mode<synchronous>, transform_indices = @transform_4, window_bounds = array<i64: 8, 1>}, {transform_indices = @transform_5, window_bounds = array<i64: 1, 8, 256>}]} {
    %c0 = arith.constant 0 : index
    %c0_0 = arith.constant 0 : index
    %c0_1 = arith.constant 0 : index
    %0 = vector.load %arg2[%c0, %c0_0, %c0_1] : memref<1x4x256xf32, #tpu.memory_space<vmem>>, vector<1x4x256xf32>
    %1 = vector.shape_cast %0 : vector<1x4x256xf32> to vector<4x256xf32>
    %c0_2 = arith.constant 0 : index
    %c0_3 = arith.constant 0 : index
    %2 = vector.load %arg3[%c0_2, %c0_3] : memref<4x1xf32, #tpu.memory_space<vmem>>, vector<4x1xf32>
    %3 = vector.broadcast %2 : vector<4x1xf32> to vector<4x256xf32>
    %4 = arith.mulf %1, %3 : vector<4x256xf32>
    %c0_4 = arith.constant 0 : index
    %c0_5 = arith.constant 0 : index
    %5 = vector.load %arg4[%c0_4, %c0_5] : memref<4x1xf32, #tpu.memory_space<vmem>>, vector<4x1xf32>
    %6 = vector.broadcast %5 : vector<4x1xf32> to vector<4x256xf32>
    %7 = arith.addf %4, %6 : vector<4x256xf32>
    %8 = arith.negf %7 : vector<4x256xf32>
    %9 = math.exp %8 : vector<4x256xf32>
    %cst = arith.constant 1.000000e+00 : f32
    %10 = vector.broadcast %cst : f32 to vector<4x256xf32>
    %11 = arith.addf %10, %9 : vector<4x256xf32>
    %12 = arith.divf %10, %11 : vector<4x256xf32>
    %13 = arith.mulf %12, %1 : vector<4x256xf32>
    %14 = arith.truncf %13 : vector<4x256xf32> to vector<4x256xbf16>
    %c0_6 = arith.constant 0 : index
    %c0_7 = arith.constant 0 : index
    %15 = vector.load %arg5[%c0_6, %c0_7] : memref<8x4xbf16, #tpu.memory_space<vmem>>, vector<8x4xbf16>
    %cst_8 = arith.constant dense<0.000000e+00> : vector<8x256xf32>
    %16 = tpu.matmul %15, %14, %cst_8 {dimension_numbers = #tpu.dot_dimension_numbers<[1], [0], [0], [1], [0, 0, 1, 1], [], []>} : vector<8x4xbf16>, vector<4x256xbf16>, vector<8x256xf32> -> vector<8x256xf32>
    %c0_9 = arith.constant 0 : index
    %c0_10 = arith.constant 0 : index
    %17 = vector.load %arg6[%c0_9, %c0_10] : memref<8x1xf32, #tpu.memory_space<vmem>>, vector<8x1xf32>
    %18 = vector.broadcast %17 : vector<8x1xf32> to vector<8x256xf32>
    %19 = arith.addf %16, %18 : vector<8x256xf32>
    %20 = arith.negf %19 : vector<8x256xf32>
    %21 = math.exp %20 : vector<8x256xf32>
    %cst_11 = arith.constant 1.000000e+00 : f32
    %22 = vector.broadcast %cst_11 : f32 to vector<8x256xf32>
    %23 = arith.addf %22, %21 : vector<8x256xf32>
    %24 = arith.divf %22, %23 : vector<8x256xf32>
    %25 = arith.mulf %19, %24 : vector<8x256xf32>
    %c0_12 = arith.constant 0 : index
    %c0_13 = arith.constant 0 : index
    %c0_14 = arith.constant 0 : index
    %26 = vector.load %arg7[%c0_12, %c0_13, %c0_14] : memref<1x8x256xf32, #tpu.memory_space<vmem>>, vector<1x8x256xf32>
    %27 = vector.shape_cast %26 : vector<1x8x256xf32> to vector<8x256xf32>
    %28 = vector.shape_cast %25 : vector<8x256xf32> to vector<1x8x256xf32>
    tpu.vector_store %arg7[%c0_12, %c0_13, %c0_14], %28 {strides = array<i32>} : memref<1x8x256xf32, #tpu.memory_space<vmem>>, vector<1x8x256xf32>,
    return
  }
  func.func @transform_0(%arg0: i32, %arg1: i32) -> (i32, i32, i32) {
    %c0_i32 = arith.constant 0 : i32
    %c0_i32_0 = arith.constant 0 : i32
    return %arg0, %c0_i32, %arg1 : i32, i32, i32
  }
  func.func @transform_1(%arg0: i32, %arg1: i32) -> (i32, i32) {
    %c0_i32 = arith.constant 0 : i32
    %c0_i32_0 = arith.constant 0 : i32
    %c0_i32_1 = arith.constant 0 : i32
    return %c0_i32, %c0_i32_0 : i32, i32
  }
  func.func @transform_2(%arg0: i32, %arg1: i32) -> (i32, i32) {
    %c0_i32 = arith.constant 0 : i32
    %c0_i32_0 = arith.constant 0 : i32
    %c0_i32_1 = arith.constant 0 : i32
    return %c0_i32, %c0_i32_0 : i32, i32
  }
  func.func @transform_3(%arg0: i32, %arg1: i32) -> (i32, i32) {
    %c0_i32 = arith.constant 0 : i32
    %c0_i32_0 = arith.constant 0 : i32
    %c0_i32_1 = arith.constant 0 : i32
    return %c0_i32, %c0_i32_0 : i32, i32
  }
  func.func @transform_4(%arg0: i32, %arg1: i32) -> (i32, i32) {
    %c0_i32 = arith.constant 0 : i32
    %c0_i32_0 = arith.constant 0 : i32
    %c0_i32_1 = arith.constant 0 : i32
    return %c0_i32, %c0_i32_0 : i32, i32
  }
  func.func @transform_5(%arg0: i32, %arg1: i32) -> (i32, i32, i32) {
    %c0_i32 = arith.constant 0 : i32
    %c0_i32_0 = arith.constant 0 : i32
    return %arg0, %c0_i32, %arg1 : i32, i32, i32
  }
}

</mosaic_0001>

<bundles_post_ra>
// kernel: tpu_custom_call.1
= control target key start
LH: loop header
LB: loop body
LE: loop exit
PB: predicated region body
PF: predicated region fallthrough
CT: control target
= control target key end

     0   :  { %10 = vsyncpa [#allocation3], 0  ;;  %s792_s0 = inlined_call_operand.vmem [shape: f32[2,4,256], index: 0, kind: input, shape index: {}]   ;;  %s793_s1 = inlined_call_operand.vmem [shape: f32[4,1], index: 1, kind: input, shape index: {}]   ;;  %s794_s2 = inlined_call_operand.vmem [shape: f32[4,1], index: 2, kind: input, shape index: {}]   ;;  %s795_s3 = inlined_call_operand.vmem [shape: bf16[8,4], index: 3, kind: input, shape index: {}]   ;;  %s796_s4 = inlined_call_operand.vmem [shape: f32[8,1], index: 4, kind: input, shape index: {}]   ;;  %s797_s5 = inlined_call_operand.hbm [shape: f32[2,8,256], index: 5, kind: output, shape index: {}]  }
   0x1   :  { %12 = vsyncpa [#allocation3 + $0x1], 0  ;;  %s668_s18 = smov 0   ;;  %s670_s19 = smov 0  }
   0x2   :  { %s672_s20 = smov 0   ;;  %s674_s21 = smov 0  }
   0x3   :  { %s676_s22 = smov 0   ;;  %s678_s23 = smov 0  }
   0x4 LB: > { %s464_s24 = sadd.s32 4294967295, %s633_s23   ;;  %s465_s25 = sadd.s32 4294967294, %s633_s23   ;;  %s633_s23 = sphi %s678_s23, %s18_s23   ;;  %s629_s22 = sphi %s676_s22, %s804_s22   ;;  %s625_s21 = sphi %s674_s21, %s803_s21   ;;  %s621_s20 = sphi %s672_s20, %s802_s20   ;;  %s617_s19 = sphi %s670_s19, %s801_s19   ;;  %s613_s18 = sphi %s668_s18, %s800_s18  }
   0x5   : > { %s30_s26 = sadd.s32 1, %s629_s22  ;;  %s151_s27 = sadd.s32 1, %s621_s20 }
   0x6   : > { %p32_p0 = scmp.ge.s32.totalorder %s30_s26, 2  ;;  %p161_p1 = scmp.ne.s32.totalorder %s621_s20, %s617_s19 }
   0x7   : > { %p162_p2 = scmp.eq.s32.totalorder %s464_s24, 1  ;;  %p167_p3 = scmp.ne.s32.totalorder %s617_s19, %s613_s18 }
   0x8   : > { %s806_s26 = smov (%p32_p0, %s30_s26), 0  ;;  %p168_p5 = scmp.eq.s32.totalorder %s465_s25, 1 }
   0x9   : > { %p708_p4 = por %p162_p2, %p161_p1  ;;  %s146_s29 = ssub.s32 %s629_s22, %s806_s26 }
   0xa   : > { %p468_p6 = scmp.ge.s32.totalorder %s633_s23, 1  ;;  %p149_p7 = scmp.eq.s32.totalorder %s146_s29, 0 }
   0xb   : > { %p715_p8 = por %p168_p5, %p167_p3  ;;  %p211_p9 = scmp.lt.s32.totalorder %s633_s23, 3 }
   0xc   : > { %s721_s6 = scalar_select %p149_p7, %s621_s20, %s151_s27  }
   0xd   : > { %p212_p10 = pnand %p468_p6, %p211_p9 }
   0xe   : > { %v256_v0 = vld [vmem:[%s793_s1] sm:$0xf] (!%p212_p10)  ;;  %v635_v1 = vmov (!%p212_p10), 0   ;;  %p244_p11 = scmp.lt.s32.totalorder (!%p212_p10), %s625_s21, 1  ;;  %v636_v4 = vmov (!%p212_p10), 839922192   ;;  %v264_v6 = vlaneseq (!%p212_p10) }
   0xf   : > { %215 = sbr.rel (%p212_p10) target bundleno = 445 (0x1bd), region = 40  ;;  %541 = vset.pattern.permute.xlu0 (!%p212_p10), %v635_v1  ;;  %346 = vmatprep.mubr.bf16.mxu0 (!%p212_p10), %v635_v1  ;;  %v270_v2 = vld [vmem:[%s794_s2] sm:$0xf] (!%p212_p10)  ;;  %v262_v5 = vunpack.c.l.s4 (!%p212_p10), %v636_v4  ;;  %vm307_vm0 = vcmask (!%p212_p10), 1041408   ;;  %vm303_vm1 = vcmask (!%p212_p10), 31744   ;;  %s240_s27 = sand.u32 (!%p212_p10), 1, %s617_s19  }
  0x10   : > { %259 = vperm.xlu0 (!%p212_p10), %541, %v256_v0   ;;  %542 = vset.pattern.permute.xlu1 (!%p212_p10), %v635_v1  ;;  %v297_v3 = vld [vmem:[%s796_s4] sm:$0xff] (!%p212_p10)  ;;  %v265_v8 = vshrl.u32 (!%p212_p10), %v264_v6, 7  ;;  %s469_s29 = sshll.u32 (!%p212_p10), %s240_s27, 4  ;;  %s483_s7 = sshll.u32 (!%p212_p10), %s625_s21, 8 }
  0x11   : > { %300 = vperm.xlu1 (!%p212_p10), %542, %v297_v3   ;;  %v263_v7 = vunpack.c.0.s8 (!%p212_p10), %v262_v5  ;;  %v296_v26 = vld [vmem:[%s795_s3] sm:$0xf] (!%p212_p10)  ;;  %s242_s8 = scalar_lea.vmem (!%p212_p10), [#allocation2], %s469_s29  ;;  %s745_s12 = scalar_lea.hbm (!%p212_p10), %s797_s5, %s483_s7 }
  0x12   : > { %s388_s9 = sshll.u32 (!%p212_p10), %s242_s8, 4  ;;  %s747_s9 = int_to_ptr.vmem [resolvable:$true] %s388_s9 }
  0x13   : > { %v266_v9 = vsub.s32 (!%p212_p10), %v263_v7, %v265_v8 }
  0x14   : > { %273 = vperm.xlu0 (!%p212_p10), %541, %v270_v2  }
  0x16   : > { %s245_s13 = scalar_select %p244_p11, %s625_s21, 1 }
  0x17   : > { %s555_s21 = scalar_lea.vmem %s747_s9, 256 }
  0x18   : > { %s482_s14 = sshll.u32 %s245_s13, 3  ;;  %s372_s13 = scalar_lea.sflag [#allocation3], %s240_s27 }
  0x19   : > { %s251_s17 = scalar_lea.vmem %s792_s0, %s482_s14  ;;  %p556_p12 = scmp.ne.s32.totalorder %s747_s9, %s555_s21 }
  0x1a   : > { %v255_v12 = vld [vmem:[%s251_s17] sm:$0xff]  ;;  %s637_s14 = smov [#allocation2]  }
  0x1b   : > { %p557_p13 = pnand %p556_p12, %p708_p4  ;;  %s559_s15 = sshll.u32 %s637_s14, 4  ;;  %s560_s15 = int_to_ptr.vmem [resolvable:$false] %s559_s15 }
  0x1c   : > { %s561_s16 = scalar_lea.vmem %s560_s15, 512  ;;  %p562_p1 = scmp.lt.s32.totalorder %s747_s9, %s560_s15 }
  0x1d   : > { %p558_p0 = pneg %p557_p13  ;;  %p563_p2 = scmp.lt.s32.totalorder %s561_s16, %s555_s21 }
  0x1f   : > { %p564_p3 = por %p563_p2, %p562_p1 }
  0x21   : > { %p565_p5 = pnand %p564_p3, %p558_p0 }
  0x8f   : > { %v260_v10 = vpop.permute.xlu0 %259 }
  0x90   : > { %v267_v11 = vrot.slane %v260_v10, %v266_v9  ;;  %v301_v27 = vpop.permute.xlu1 %300 }
  0x92   : > { %v269_v14 = vmul.f32 %v267_v11, %v255_v12 }
  0x93   : > { %v274_v13 = vpop.permute.xlu0 %273 }
  0x94   : > { %v281_v15 = vrot.slane %v274_v13, %v266_v9 }
  0x96   : > { %v283_v16 = vadd.f32 %v281_v15, %v269_v14 }
  0x98   : > { %v472_v17 = vmul.f32 -1.442695, %v283_v16 }
  0x9a   : > { %543 = vpow2.f32 %v472_v17 }
  0xa4   : > { %v544_v18 = vpop.eup %543 }
  0xa5   : > { %v287_v19 = vadd.f32 1.0, %v544_v18 }
  0xa7   : > { %545 = vrcp.f32 %v287_v19 }
  0xb1   : > { %v546_v20 = vpop.eup %545 }
  0xb2   : > { %v290_v21 = vmul.f32 %v546_v20, %v255_v12 }
  0xb4   : > { %v292_v22 = vcombine.high %v290_v21, %v290_v21  ;;  %v294_v23 = vpack.c.bf16 %v290_v21, %v290_v21 }
  0xb6   : > { %v295_v24 = vpack.c.bf16 %v292_v22, %v292_v22  ;;  %v309_v25 = vsel %vm307_vm0, %v294_v23, 0 }
  0xb8   : > { %473 = vmatprep.subr.msk.bf16.mxu0 %vm307_vm0, %v295_v24 }
  0xb9   : > { %315 = vmatpush1.bf16.msra.mxu0 %v309_v25 }
  0xbc   : > { %474 = vmatmul.mubr.msk.bf16.vlgmr.msra.gmra.mrb[0].mxu0 %vm303_vm1, %v296_v26 }
 0x18f   : > { %v348_v28 = vpop.f32.mrb[0].mxu0 }
 0x190   : > { %v349_v29 = vadd.f32 %v348_v28, %v301_v27  ;;  %v350_v30 = vpop.f32.mrb[1].mxu0 }
 0x191   : > { %v351_v31 = vadd.f32 %v350_v30, %v301_v27  ;;  %v352_v32 = vpop.f32.mrb[2].mxu0 }
 0x192   : > { %v475_v33 = vmul.f32 -1.442695, %v349_v29  ;;  %v353_v34 = vpop.f32.mrb[3].mxu0 }
 0x193   : > { %v476_v35 = vmul.f32 -1.442695, %v351_v31 }
 0x194   : > { %547 = vpow2.f32 %v475_v33 }
 0x195   : > { %549 = vpow2.f32 %v476_v35 }
 0x19e   : > { %v548_v36 = vpop.eup %547 }
 0x19f   : > { %v550_v37 = vpop.eup %549  ;;  %v361_v38 = vadd.f32 1.0, %v548_v36 }
 0x1a0   : > { %v362_v39 = vadd.f32 1.0, %v550_v37 }
 0x1a1   : > { %551 = vrcp.f32 %v361_v38 }
 0x1a2   : > { %553 = vrcp.f32 %v362_v39 }
 0x1ab   : > { %v552_v40 = vpop.eup %551 }
 0x1ac   : > { %v554_v41 = vpop.eup %553  ;;  %v367_v42 = vmul.f32 %v552_v40, %v349_v29 }
 0x1ad   : > { %v368_v43 = vmul.f32 %v554_v41, %v351_v31 }
 0x1ae   : > { %369 = vst [vmem:[%s242_s8] sm:$0xff] %v367_v42 }
 0x1af   : > { %370 = vst [vmem:[%s242_s8 + $0x8] sm:$0xff] %v368_v43 }
 0x1b0   : > { %568 = shalt.err (!%p565_p5)
}
 0x1b1   : > { %s569_s17 = scalar_lea.hbm %s745_s12, 256  ;;  %s573_s27 = scalar_lea.hbm %s797_s5, 512 }
 0x1b2   : > { %p570_p6 = scmp.ne.s32.totalorder %s745_s12, %s569_s17  ;;  %p574_p10 = scmp.lt.u32.totalorder %s745_s12, %s797_s5 }
 0x1b3   : > { %p575_p11 = scmp.lt.u32.totalorder %s573_s27, %s569_s17  ;;  %p577_p13 = scmp.lt.u32.totalorder %s569_s17, %s745_s12 }
 0x1b4   : > { %p571_p7 = pnand %p570_p6, %p708_p4 }
 0x1b5   : > { %p576_p12 = por %p575_p11, %p574_p10 }
 0x1b6   : > { %p572_p9 = pneg %p571_p7 }
 0x1b7   : > { %p578_p0 = por %p577_p13, %p576_p12 }
 0x1b9   : > { %p579_p1 = pnand %p578_p0, %p572_p9 }
 0x1bb   : > { %582 = shalt.err (!%p579_p1)
}
 0x1bc   : > { %484 = dma.vmem_to_hbm [thread:$0]  (%p708_p4), %s747_s9, 256, %s745_s12, %s372_s13  }
 0x1bd PF: > { %p490_p2 = scmp.ge.s32.totalorder %s633_s23, 2  ;;  %s400_s8 = sand.u32 1, %s613_s18  }
 0x1be   : > { %s401_s10 = scalar_lea.sflag [#allocation3], %s400_s8 }
 0x1bf   : > { %p487_p3 = pnand %p490_p2, %p715_p8 }
 0x1c1   : > { %608 = dma.done.wait (!%p487_p3), %s401_s10, 256  }
 0x1c2   : > { %610 = vsyncadd (!%p487_p3), %s401_s10, 4294967040  ;;  %s18_s23 = sadd.s32 1, %s633_s23   ;;  %s800_s18 = smov %s617_s19 }
 0x1c3   : > { %p15_p5 = scmp.ge.s32.totalorder %s18_s23, 4   ;;  %s801_s19 = smov %s621_s20 }
 0x1c4   : > { %s802_s20 = smov %s721_s6  ;;  %s803_s21 = smov %s629_s22 }
 0x1c5   : > { %s804_s22 = smov %s806_s26  ;;  %17 = sbr.rel (!%p15_p5) target bundleno = 4 (0x4), region = 75 }
 0x1cc   :  { %406 = vsyncpa [#allocation3], 1 }
 0x1cd   :  { %408 = vsyncpa [#allocation3 + $0x1], 1 }

</bundles_post_ra>
